<compile_context>
chip_gen: v5e
topology: v5e:2x2
jax: 0.10.0
libtpu: 0.0.40
codegen_flags: <defaults>
</compile_context>

<pallas_src>
import functools

import numpy as np
import jax
import jax.numpy as jnp
from jax.experimental import pallas as pl
from jax.experimental.pallas import tpu as pltpu


def _round_up(x, m):
    return ((x + m - 1) // m) * m


def _make_stft_basis(n_fft):
    """Hann-windowed forward real-DFT basis, matching torch-stft's forward_basis.

    Returns (basis, cutoff, f_pad): basis is float32 (n_fft, 2*f_pad) with columns
    [0:cutoff] = windowed cos, [f_pad:f_pad+cutoff] = windowed -sin; each half is
    zero-padded to a multiple of 128 lanes (zero columns contribute 0 to the loss).
    """
    cutoff = n_fft // 2 + 1
    f_pad = _round_up(cutoff, 128)
    n = np.arange(n_fft)
    k = np.arange(cutoff)
    ang = 2.0 * np.pi * np.outer(k, n) / n_fft              # (cutoff, n_fft)
    real = np.cos(ang)                                       # Re{exp(-j*ang)}
    imag = -np.sin(ang)                                      # Im{exp(-j*ang)}
    window = 0.5 * (1.0 - np.cos(2.0 * np.pi * n / n_fft))   # periodic Hann (fftbins=True)
    br = np.zeros((n_fft, f_pad), np.float32)
    bi = np.zeros((n_fft, f_pad), np.float32)
    br[:, :cutoff] = (real * window).T
    bi[:, :cutoff] = (imag * window).T
    basis = np.concatenate([br, bi], axis=1)                 # (n_fft, 2*f_pad)
    return basis, cutoff, f_pad


def _frame(x, n_fft, hop):
    """Reflection-pad by n_fft//2 and extract overlapping frames. (L,) -> (T, n_fft)."""
    pad = n_fft // 2
    xp = jnp.pad(x, (pad, pad), mode="reflect")
    t = (xp.shape[0] - n_fft) // hop + 1
    if n_fft == 2 * hop and xp.shape[0] % hop == 0:
        # Gather-free framing: frame[t] = [block[t], block[t+1]] of hop-sized blocks.
        blocks = xp.reshape(-1, hop)                         # (t + 1, hop)
        frames = jnp.concatenate([blocks[:-1], blocks[1:]], axis=1)
    else:
        idx = jnp.arange(t)[:, None] * hop + jnp.arange(n_fft)[None, :]
        frames = xp[idx]
    return frames, t


def _pcg_loss_kernel(xf_ref, basis_ref, pw_ref, tw_ref, out_ref, acc_ref, *,
                     tile_t, f_pad, alpha, beta, spec_count, time_count):
    step = pl.program_id(0)

    @pl.when(step == 0)
    def _init():
        acc_ref[0] = jnp.float32(0.0)

    # One fused MXU matmul per tile: rows [:tile_t] are pred frames, [tile_t:] are target
    # frames; basis columns [:f_pad] are the real basis, [f_pad:] the imaginary basis.
    x = xf_ref[...]                                                       # bf16 (2*TILE_T, n_fft)
    res = jnp.dot(x, basis_ref[...], preferred_element_type=jnp.float32)  # f32 (2*TILE_T, 2*F_pad)

    pr = res[:tile_t, :f_pad]
    pi = res[:tile_t, f_pad:]
    tr = res[tile_t:, :f_pad]
    ti = res[tile_t:, f_pad:]
    p_mag = jnp.sqrt(pr * pr + pi * pi)
    t_mag = jnp.sqrt(tr * tr + ti * ti)
    # Zero-padded frame rows / frequency columns are zero in BOTH magnitudes -> contribute 0,
    # so dividing by the true element count reproduces F.l1_loss (mean).
    acc_ref[0] += jnp.sum(jnp.abs(p_mag - t_mag))

    @pl.when(step == pl.num_programs(0) - 1)
    def _finalize():
        loss_spec = acc_ref[0] / spec_count
        time_sum = jnp.sum(jnp.abs(pw_ref[...] - tw_ref[...]))
        out_ref[0, 0] = (alpha + beta) * loss_spec + time_sum / time_count


def pcg_loss(pred_wave, target_wave, *, n_fft=2048, hop_length=1024,
             alpha=10.0, beta=1.0, tile_t_max=256):
    assert pred_wave.shape == target_wave.shape
    B, L = pred_wave.shape
    # Literal `pred_mag, _ = transform(x)[0]` unpack of a (B, F, T) tensor needs B == 2.
    assert B == 2, "PCGLoss forward semantics require batch size 2"

    basis_np, cutoff, f_pad = _make_stft_basis(n_fft)
    basis = jnp.asarray(basis_np, dtype=jnp.bfloat16)        # (n_fft, 2*f_pad), VMEM-resident

    # Spectral loss only uses magnitude[0]: frame batch element 0 only (halves framing work).
    pf0, T = _frame(pred_wave[0].astype(jnp.float32), n_fft, hop_length)
    tf0, _ = _frame(target_wave[0].astype(jnp.float32), n_fft, hop_length)

    tile_t = min(tile_t_max, _round_up(T, 16))               # bf16 sublane-tile aligned
    t_pad = _round_up(T, tile_t)
    grid_n = t_pad // tile_t

    def prep_frames(fr):
        fr = jnp.pad(fr, ((0, t_pad - T), (0, 0))).astype(jnp.bfloat16)
        return fr.reshape(grid_n, tile_t, n_fft)

    # Tile-interleaved stacking: rows [g*2*tile_t : g*2*tile_t+tile_t] = pred tile g,
    # the next tile_t rows = target tile g -> one contiguous (2*TILE_T, n_fft) block per step.
    xf = jnp.concatenate([prep_frames(pf0), prep_frames(tf0)],
                         axis=1).reshape(grid_n * 2 * tile_t, n_fft)

    # Lane-dense layout for the time-domain L1 (rows of 128 lanes, zero-padded tail).
    n_time = B * L
    w_rows = _round_up(pl.cdiv(n_time, 128), 8)

    def prep_wave(w):
        flat = jnp.pad(w.astype(jnp.float32).reshape(-1), (0, w_rows * 128 - n_time))
        return flat.reshape(w_rows, 128)

    pw2 = prep_wave(pred_wave)
    tw2 = prep_wave(target_wave)

    kernel = functools.partial(
        _pcg_loss_kernel,
        tile_t=tile_t, f_pad=f_pad,
        alpha=float(alpha), beta=float(beta),
        spec_count=float(T * cutoff), time_count=float(n_time))

    cost = pl.CostEstimate(
        flops=2 * (2 * t_pad) * n_fft * (2 * f_pad) + 8 * t_pad * f_pad,
        transcendentals=2 * t_pad * f_pad,
        bytes_accessed=xf.size * 2 + basis.size * 2 + (pw2.size + tw2.size) * 4 + 4)

    out = pl.pallas_call(
        kernel,
        out_shape=jax.ShapeDtypeStruct((1, 1), jnp.float32),
        grid_spec=pltpu.PrefetchScalarGridSpec(
            num_scalar_prefetch=0,
            grid=(grid_n,),
            in_specs=[
                pl.BlockSpec((2 * tile_t, n_fft), lambda i: (i, 0)),   # frame tiles (pipelined)
                pl.BlockSpec((n_fft, 2 * f_pad), lambda i: (0, 0)),    # DFT basis (resident)
                pl.BlockSpec((w_rows, 128), lambda i: (0, 0)),         # pred wave (resident)
                pl.BlockSpec((w_rows, 128), lambda i: (0, 0)),         # target wave (resident)
            ],
            out_specs=pl.BlockSpec((1, 1), lambda i: (0, 0),
                                   memory_space=pltpu.MemorySpace.SMEM),
            scratch_shapes=[pltpu.SMEM((1,), jnp.float32)],
        ),
        compiler_params=pltpu.CompilerParams(
            dimension_semantics=("arbitrary",),
            vmem_limit_bytes=64 * 1024 * 1024,
        ),
        cost_estimate=cost,
    )(xf, basis, pw2, tw2)
    return out[0, 0]


def _pcg_loss_ref(pred_wave, target_wave, *, n_fft=2048, hop_length=1024, alpha=10.0, beta=1.0):
    """Plain-JAX f32 reference of the same math (for a sanity check)."""
    basis_np, cutoff, f_pad = _make_stft_basis(n_fft)
    basis = jnp.asarray(basis_np)
    br = basis[:, :cutoff]
    bi = basis[:, f_pad:f_pad + cutoff]
    pf, _ = _frame(pred_wave[0].astype(jnp.float32), n_fft, hop_length)
    tf, _ = _frame(target_wave[0].astype(jnp.float32), n_fft, hop_length)

    def mag(frames):
        r = frames @ br
        i = frames @ bi
        return jnp.sqrt(r * r + i * i)

    loss_spec = jnp.mean(jnp.abs(mag(pf) - mag(tf)))
    loss_time = jnp.mean(jnp.abs(pred_wave - target_wave))
    return alpha * loss_spec + loss_time + beta * loss_spec


if __name__ == "__main__":
    key = jax.random.PRNGKey(0)
    k1, k2 = jax.random.split(key)
    B, L = 2, 512                      # small shapes; module defaults (n_fft=2048, hop=1024) also work
    pred_wave = jax.random.normal(k1, (B, L), dtype=jnp.float32)
    target_wave = jax.random.normal(k2, (B, L), dtype=jnp.float32)

    loss = pcg_loss(pred_wave, target_wave, n_fft=128, hop_length=64, alpha=10.0, beta=1.0)
    jax.block_until_ready(loss)

    ref = _pcg_loss_ref(pred_wave, target_wave, n_fft=128, hop_length=64, alpha=10.0, beta=1.0)
    # bf16 matmul inputs -> relaxed tolerance vs. the pure-f32 reference.
    assert jnp.allclose(loss, ref, rtol=2e-2, atol=1e-2), (loss, ref)

    print("KERNEL_OK")
</pallas_src>

<mosaic_0001>
module attributes {stable_mosaic.version = 11 : i64} {
  func.func @_pcg_loss_kernel(%arg0: i32, %arg1: memref<32x128xbf16, #tpu.memory_space<vmem>>, %arg2: memref<128x256xbf16, #tpu.memory_space<vmem>>, %arg3: memref<8x128xf32, #tpu.memory_space<vmem>>, %arg4: memref<8x128xf32, #tpu.memory_space<vmem>>, %arg5: memref<1x1xf32, #tpu.memory_space<smem>>, %arg6: memref<1xf32, #tpu.memory_space<smem>>) attributes {dimension_semantics = [#tpu.dimension_semantics<arbitrary>], iteration_bounds = array<i64: 1>, scalar_prefetch = 0 : i64, scratch_operands = 1 : i64, tpu.core_type = #tpu.core_type<tc>, window_params = [{transform_indices = @transform_0, window_bounds = array<i64: 32, 128>}, {pipeline_mode = #tpu.pipeline_mode<synchronous>, transform_indices = @transform_1, window_bounds = array<i64: 128, 256>}, {pipeline_mode = #tpu.pipeline_mode<synchronous>, transform_indices = @transform_2, window_bounds = array<i64: 8, 128>}, {pipeline_mode = #tpu.pipeline_mode<synchronous>, transform_indices = @transform_3, window_bounds = array<i64: 8, 128>}, {transform_indices = @transform_4, window_bounds = array<i64: 1, 1>}]} {
    %c0_i32 = arith.constant 0 : i32
    %0 = arith.cmpi eq, %arg0, %c0_i32 : i32
    %1 = arith.extui %0 : i1 to i32
    %c0_i32_0 = arith.constant 0 : i32
    %2 = arith.cmpi ne, %1, %c0_i32_0 : i32
    scf.if %2 {
      %cst_9 = arith.constant 0.000000e+00 : f32
      %c0_10 = arith.constant 0 : index
      %30 = memref.load %arg6[%c0_10] : memref<1xf32, #tpu.memory_space<smem>>
      memref.store %cst_9, %arg6[%c0_10] : memref<1xf32, #tpu.memory_space<smem>>
    } else {
    }
    %c0 = arith.constant 0 : index
    %c0_1 = arith.constant 0 : index
    %3 = vector.load %arg1[%c0, %c0_1] : memref<32x128xbf16, #tpu.memory_space<vmem>>, vector<32x128xbf16>
    %c0_2 = arith.constant 0 : index
    %c0_3 = arith.constant 0 : index
    %4 = vector.load %arg2[%c0_2, %c0_3] : memref<128x256xbf16, #tpu.memory_space<vmem>>, vector<128x256xbf16>
    %cst = arith.constant dense<0.000000e+00> : vector<32x256xf32>
    %5 = tpu.matmul %3, %4, %cst {dimension_numbers = #tpu.dot_dimension_numbers<[1], [0], [0], [1], [0, 0, 1, 1], [], []>} : vector<32x128xbf16>, vector<128x256xbf16>, vector<32x256xf32> -> vector<32x256xf32>
    %6 = vector.extract_strided_slice %5 {offsets = [0, 0], sizes = [16, 128], strides = [1, 1]} : vector<32x256xf32> to vector<16x128xf32>
    %7 = vector.extract_strided_slice %5 {offsets = [0, 128], sizes = [16, 128], strides = [1, 1]} : vector<32x256xf32> to vector<16x128xf32>
    %8 = vector.extract_strided_slice %5 {offsets = [16, 0], sizes = [16, 128], strides = [1, 1]} : vector<32x256xf32> to vector<16x128xf32>
    %9 = vector.extract_strided_slice %5 {offsets = [16, 128], sizes = [16, 128], strides = [1, 1]} : vector<32x256xf32> to vector<16x128xf32>
    %10 = arith.mulf %6, %6 : vector<16x128xf32>
    %11 = arith.mulf %7, %7 : vector<16x128xf32>
    %12 = arith.addf %10, %11 : vector<16x128xf32>
    %13 = math.sqrt %12 : vector<16x128xf32>
    %14 = arith.mulf %8, %8 : vector<16x128xf32>
    %15 = arith.mulf %9, %9 : vector<16x128xf32>
    %16 = arith.addf %14, %15 : vector<16x128xf32>
    %17 = math.sqrt %16 : vector<16x128xf32>
    %c0_4 = arith.constant 0 : index
    %18 = memref.load %arg6[%c0_4] : memref<1xf32, #tpu.memory_space<smem>>
    %19 = arith.subf %13, %17 : vector<16x128xf32>
    %20 = math.absf %19 : vector<16x128xf32>
    %21 = vector.shape_cast %20 : vector<16x128xf32> to vector<1x16x128xf32>
    %cst_5 = arith.constant dense<0.000000e+00> : vector<1xf32>
    %22 = vector.multi_reduction <add>, %21, %cst_5 [1, 2] : vector<1x16x128xf32> to vector<1xf32>
    %23 = vector.shape_cast %22 : vector<1xf32> to vector<1x1x1xf32>
    %24 = vector.extract %23[0, 0, 0] : f32 from vector<1x1x1xf32>
    %25 = arith.addf %18, %24 : f32
    %c0_6 = arith.constant 0 : index
    %26 = memref.load %arg6[%c0_6] : memref<1xf32, #tpu.memory_space<smem>>
    memref.store %25, %arg6[%c0_6] : memref<1xf32, #tpu.memory_space<smem>>
    %c0_i32_7 = arith.constant 0 : i32
    %27 = arith.cmpi eq, %arg0, %c0_i32_7 : i32
    %28 = arith.extui %27 : i1 to i32
    %c0_i32_8 = arith.constant 0 : i32
    %29 = arith.cmpi ne, %28, %c0_i32_8 : i32
    scf.if %29 {
      %c0_9 = arith.constant 0 : index
      %30 = memref.load %arg6[%c0_9] : memref<1xf32, #tpu.memory_space<smem>>
      %cst_10 = arith.constant 5.850000e+02 : f32
      %31 = arith.divf %30, %cst_10 : f32
      %c0_11 = arith.constant 0 : index
      %c0_12 = arith.constant 0 : index
      %32 = vector.load %arg3[%c0_11, %c0_12] : memref<8x128xf32, #tpu.memory_space<vmem>>, vector<8x128xf32>
      %c0_13 = arith.constant 0 : index
      %c0_14 = arith.constant 0 : index
      %33 = vector.load %arg4[%c0_13, %c0_14] : memref<8x128xf32, #tpu.memory_space<vmem>>, vector<8x128xf32>
      %34 = arith.subf %32, %33 : vector<8x128xf32>
      %35 = math.absf %34 : vector<8x128xf32>
      %36 = vector.shape_cast %35 : vector<8x128xf32> to vector<1x8x128xf32>
      %cst_15 = arith.constant dense<0.000000e+00> : vector<1xf32>
      %37 = vector.multi_reduction <add>, %36, %cst_15 [1, 2] : vector<1x8x128xf32> to vector<1xf32>
      %38 = vector.shape_cast %37 : vector<1xf32> to vector<1x1x1xf32>
      %39 = vector.extract %38[0, 0, 0] : f32 from vector<1x1x1xf32>
      %cst_16 = arith.constant 1.100000e+01 : f32
      %40 = arith.mulf %cst_16, %31 : f32
      %cst_17 = arith.constant 1.024000e+03 : f32
      %41 = arith.divf %39, %cst_17 : f32
      %42 = arith.addf %40, %41 : f32
      %c0_18 = arith.constant 0 : index
      %c0_19 = arith.constant 0 : index
      %43 = memref.load %arg5[%c0_18, %c0_19] : memref<1x1xf32, #tpu.memory_space<smem>>
      memref.store %42, %arg5[%c0_18, %c0_19] : memref<1x1xf32, #tpu.memory_space<smem>>
    } else {
    }
    return
  }
  func.func @transform_0(%arg0: i32) -> (i32, i32) {
    %c0_i32 = arith.constant 0 : i32
    %c0_i32_0 = arith.constant 0 : i32
    return %arg0, %c0_i32 : i32, i32
  }
  func.func @transform_1(%arg0: i32) -> (i32, i32) {
    %c0_i32 = arith.constant 0 : i32
    %c0_i32_0 = arith.constant 0 : i32
    %c0_i32_1 = arith.constant 0 : i32
    return %c0_i32, %c0_i32_0 : i32, i32
  }
  func.func @transform_2(%arg0: i32) -> (i32, i32) {
    %c0_i32 = arith.constant 0 : i32
    %c0_i32_0 = arith.constant 0 : i32
    %c0_i32_1 = arith.constant 0 : i32
    return %c0_i32, %c0_i32_0 : i32, i32
  }
  func.func @transform_3(%arg0: i32) -> (i32, i32) {
    %c0_i32 = arith.constant 0 : i32
    %c0_i32_0 = arith.constant 0 : i32
    %c0_i32_1 = arith.constant 0 : i32
    return %c0_i32, %c0_i32_0 : i32, i32
  }
  func.func @transform_4(%arg0: i32) -> (i32, i32) {
    %c0_i32 = arith.constant 0 : i32
    %c0_i32_0 = arith.constant 0 : i32
    %c0_i32_1 = arith.constant 0 : i32
    return %c0_i32, %c0_i32_0 : i32, i32
  }
}

</mosaic_0001>

<bundles_post_ra>
// kernel: tpu_custom_call.1
= control target key start
LH: loop header
LB: loop body
LE: loop exit
PB: predicated region body
PF: predicated region fallthrough
CT: control target
= control target key end

     0   :  { %9 = vsyncpa [#allocation4], 0  ;;  %s672_s0 = inlined_call_operand.hbm [shape: bf16[32,128], index: 0, kind: input, shape index: {}]   ;;  %s673_s1 = inlined_call_operand.hbm [shape: bf16[128,256], index: 1, kind: input, shape index: {}]   ;;  %s674_s2 = inlined_call_operand.hbm [shape: f32[8,128], index: 2, kind: input, shape index: {}]   ;;  %s675_s3 = inlined_call_operand.hbm [shape: f32[8,128], index: 3, kind: input, shape index: {}]   ;;  %s676_s4 = inlined_call_operand.hbm [shape: f32[1,1], index: 4, kind: output, shape index: {}]  }
   0x1   :  { %10 = vsyncpa [#allocation7], 0 }
   0x2   :  { %11 = vsyncpa [#allocation10], 0  ;;  %s30_s17 = sshll.u32 %s673_s1, 4  ;;  %s31_s17 = int_to_ptr.hbm [resolvable:$true] %s30_s17 }
   0x3   :  { %12 = vsyncpa [#allocation5], 0  ;;  %s621_s18 = smov [#allocation6]   ;;  %s17_s22 = sshll.u32 %s672_s0, 4  ;;  %s18_s22 = int_to_ptr.hbm [resolvable:$true] %s17_s22 }
   0x4   :  { %s32_s19 = sshll.u32 %s621_s18, 4  ;;  %s622_s23 = smov 128   ;;  %s33_s19 = int_to_ptr.vmem [resolvable:$true] %s32_s19 }
   0x5   :  { %s623_s24 = smov 8   ;;  %s624_s25 = smov [#allocation3]  }
   0x6   :  { %38 = dma.hbm_to_vmem [thread:$0]  %s31_s17, 2048, %s33_s19, [#allocation7], %s622_s23, %s622_s23, %s623_s24  }
   0x7   :  { %s19_s26 = sshll.u32 %s624_s25, 4  ;;  %s625_s27 = smov 64   ;;  %s20_s26 = int_to_ptr.vmem [resolvable:$true] %s19_s26 }
   0x8   :  { %s626_s28 = smov 4   ;;  %s44_s30 = sshll.u32 %s674_s2, 4  ;;  %s45_s30 = int_to_ptr.hbm [resolvable:$true] %s44_s30 }
   0x9   :  { %25 = dma.hbm_to_vmem [thread:$0]  %s18_s22, 256, %s20_s26, [#allocation4], %s625_s27, %s625_s27, %s626_s28  }
   0xa   :  { %s627_s5 = smov [#allocation8]   ;;  %s55_s8 = sshll.u32 %s675_s3, 4  ;;  %s56_s8 = int_to_ptr.hbm [resolvable:$true] %s55_s8 }
   0xb   :  { %s46_s6 = sshll.u32 %s627_s5, 4  ;;  %s628_s9 = smov [#allocation9]   ;;  %s47_s6 = int_to_ptr.vmem [resolvable:$true] %s46_s6 }
   0xc   :  { %49 = dma.hbm_to_vmem [thread:$0]  %s45_s30, 128, %s47_s6, [#allocation7]  }
   0xd   :  { %s57_s10 = sshll.u32 %s628_s9, 4  ;;  %s58_s10 = int_to_ptr.vmem [resolvable:$true] %s57_s10 }
   0xe   :  { %60 = dma.hbm_to_vmem [thread:$0]  %s56_s8, 128, %s58_s10, [#allocation10]  }
   0xf   :  { %613 = dma.done.wait [#allocation4], 256  }
  0x10   :  { %614 = vsyncadd [#allocation4], 4294967040 }
  0x11   :  { %615 = dma.done.wait [#allocation7], 2176  }
  0x12   :  { %616 = vsyncadd [#allocation7], 4294965120 }
  0x13   :  { %617 = dma.done.wait [#allocation10], 128  }
  0x14   :  { %618 = vsyncadd [#allocation10], 4294967168  ;;  %v434_v0 = vld [vmem:[#allocation6 + $0x70] sm:$0xf]  ;;  %v457_v1 = vld [vmem:[#allocation6 + $0x74] sm:$0xf0] }
  0x15   :  { %v456_v2 = vld [vmem:[#allocation6 + $0x74] sm:$0xf]  ;;  %v435_v3 = vor.u32 %v457_v1, %v434_v0  ;;  %v436_v4 = vld [vmem:[#allocation6 + $0x78] sm:$0xf0]  ;;  %v426_v5 = vld [vmem:[#allocation6 + $0x60] sm:$0xf] }
  0x16   :  { %v455_v6 = vld [vmem:[#allocation6 + $0x64] sm:$0xf0]  ;;  %v439_v7 = vor.u32 %v456_v2, %v436_v4  ;;  %v454_v8 = vld [vmem:[#allocation6 + $0x64] sm:$0xf]  ;;  %v428_v9 = vld [vmem:[#allocation6 + $0x68] sm:$0xf0] }
  0x17   :  { %195 = vmatpush.bf16.msra.mxu0 %v435_v3  ;;  %458 = vmatpush.bf16.msra.mxu2 %v435_v3  ;;  %v427_v10 = vor.u32 %v455_v6, %v426_v5  ;;  %v431_v11 = vor.u32 %v454_v8, %v428_v9  ;;  %v418_v12 = vld [vmem:[#allocation6 + $0x50] sm:$0xf]  ;;  %v453_v13 = vld [vmem:[#allocation6 + $0x54] sm:$0xf0]  ;;  %v452_v14 = vld [vmem:[#allocation6 + $0x54] sm:$0xf] }
  0x18   :  { %214 = vmatpush.bf16.msra.mxu1 %v439_v7  ;;  %466 = vmatpush.bf16.msra.mxu3 %v439_v7  ;;  %v420_v15 = vld [vmem:[#allocation6 + $0x58] sm:$0xf0]  ;;  %v419_v16 = vor.u32 %v453_v13, %v418_v12  ;;  %v410_v18 = vld [vmem:[#allocation6 + $0x40] sm:$0xf]  ;;  %v451_v19 = vld [vmem:[#allocation6 + $0x44] sm:$0xf0] }
  0x19   :  { %v423_v17 = vor.u32 %v452_v14, %v420_v15  ;;  %v450_v20 = vld [vmem:[#allocation6 + $0x44] sm:$0xf]  ;;  %v412_v21 = vld [vmem:[#allocation6 + $0x48] sm:$0xf0]  ;;  %v411_v22 = vor.u32 %v451_v19, %v410_v18  ;;  %v402_v24 = vld [vmem:[#allocation6 + $0x30] sm:$0xf] }
  0x1a   :  { %v415_v23 = vor.u32 %v450_v20, %v412_v21  ;;  %v449_v25 = vld [vmem:[#allocation6 + $0x34] sm:$0xf0]  ;;  %v448_v26 = vld [vmem:[#allocation6 + $0x34] sm:$0xf]  ;;  %v404_v27 = vld [vmem:[#allocation6 + $0x38] sm:$0xf0] }
  0x1b   :  { %196 = vmatpush.bf16.msra.mxu0 %v427_v10  ;;  %459 = vmatpush.bf16.msra.mxu2 %v427_v10  ;;  %v403_v28 = vor.u32 %v449_v25, %v402_v24  ;;  %v407_v29 = vor.u32 %v448_v26, %v404_v27  ;;  %v394_v30 = vld [vmem:[#allocation6 + $0x20] sm:$0xf]  ;;  %v447_v31 = vld [vmem:[#allocation6 + $0x24] sm:$0xf0]  ;;  %v446_v32 = vld [vmem:[#allocation6 + $0x24] sm:$0xf] }
  0x1c   :  { %215 = vmatpush.bf16.msra.mxu1 %v431_v11  ;;  %467 = vmatpush.bf16.msra.mxu3 %v431_v11  ;;  %v396_v33 = vld [vmem:[#allocation6 + $0x28] sm:$0xf0]  ;;  %v395_v34 = vor.u32 %v447_v31, %v394_v30  ;;  %v386_v36 = vld [vmem:[#allocation6 + $0x10] sm:$0xf]  ;;  %v445_v37 = vld [vmem:[#allocation6 + $0x14] sm:$0xf0] }
  0x1d   :  { %v399_v35 = vor.u32 %v446_v32, %v396_v33  ;;  %v444_v38 = vld [vmem:[#allocation6 + $0x14] sm:$0xf]  ;;  %v388_v39 = vld [vmem:[#allocation6 + $0x18] sm:$0xf0]  ;;  %v387_v40 = vor.u32 %v445_v37, %v386_v36  ;;  %v378_v42 = vld [vmem:[#allocation6] sm:$0xf] }
  0x1e   :  { %v391_v41 = vor.u32 %v444_v38, %v388_v39  ;;  %v443_v43 = vld [vmem:[#allocation6 + $0x4] sm:$0xf0]  ;;  %v442_v44 = vld [vmem:[#allocation6 + $0x4] sm:$0xf]  ;;  %v380_v45 = vld [vmem:[#allocation6 + $0x8] sm:$0xf0] }
  0x1f   :  { %197 = vmatpush.bf16.msra.mxu0 %v419_v16  ;;  %460 = vmatpush.bf16.msra.mxu2 %v419_v16  ;;  %v379_v46 = vor.u32 %v443_v43, %v378_v42  ;;  %v383_v47 = vor.u32 %v442_v44, %v380_v45  ;;  %v440_v48 = vld [vmem:[#allocation3] sm:$0xff]  ;;  %v441_v49 = vld [vmem:[#allocation3 + $0x8] sm:$0xff]  ;;  %s355_s15 = sshll.u32 %s676_s4, 4  ;;  %s631_s20 = smov [#allocation11]   ;;  %s356_s15 = int_to_ptr.hbm [resolvable:$true] %s355_s15 }
  0x20   :  { %216 = vmatpush.bf16.msra.mxu1 %v423_v17  ;;  %468 = vmatpush.bf16.msra.mxu3 %v423_v17 }
  0x23   :  { %198 = vmatpush.bf16.msra.mxu0 %v411_v22  ;;  %461 = vmatpush.bf16.msra.mxu2 %v411_v22 }
  0x24   :  { %217 = vmatpush.bf16.msra.mxu1 %v415_v23  ;;  %469 = vmatpush.bf16.msra.mxu3 %v415_v23 }
  0x27   :  { %199 = vmatpush.bf16.msra.mxu0 %v403_v28  ;;  %462 = vmatpush.bf16.msra.mxu2 %v403_v28 }
  0x28   :  { %218 = vmatpush.bf16.msra.mxu1 %v407_v29  ;;  %470 = vmatpush.bf16.msra.mxu3 %v407_v29 }
  0x2b   :  { %200 = vmatpush.bf16.msra.mxu0 %v395_v34  ;;  %463 = vmatpush.bf16.msra.mxu2 %v395_v34 }
  0x2c   :  { %219 = vmatpush.bf16.msra.mxu1 %v399_v35  ;;  %471 = vmatpush.bf16.msra.mxu3 %v399_v35 }
  0x2f   :  { %201 = vmatpush.bf16.msra.mxu0 %v387_v40  ;;  %464 = vmatpush.bf16.msra.mxu2 %v387_v40 }
  0x30   :  { %220 = vmatpush.bf16.msra.mxu1 %v391_v41  ;;  %472 = vmatpush.bf16.msra.mxu3 %v391_v41 }
  0x33   :  { %202 = vmatpush.bf16.msra.mxu0 %v379_v46  ;;  %465 = vmatpush.bf16.msra.mxu2 %v379_v46 }
  0x34   :  { %221 = vmatpush.bf16.msra.mxu1 %v383_v47  ;;  %473 = vmatpush.bf16.msra.mxu3 %v383_v47 }
  0x36   :  { %203 = vmatmul.bf16.vlgmr.msra.gmra.mxu0 %v440_v48  ;;  %208 = vmatmul.bf16.vlgmr.msra.gmra.mxu2 %v441_v49 }
  0x37   :  { %222 = vmatmul.bf16.vlgmr.msra.gmra.mxu1 %v440_v48  ;;  %227 = vmatmul.bf16.vlgmr.msra.gmra.mxu3 %v441_v49 }
  0xb3   :  { %v204_v50 = vpop.f32.mrf.mxu0 }
  0xb4   :  { %v233_v51 = vmul.f32 %v204_v50, %v204_v50  ;;  %v223_v52 = vpop.f32.mrf.mxu1  ;;  %v324_v50 = vld [vmem:[#allocation8] sm:$0xff] }
  0xb5   :  { %v235_v53 = vmul.f32 %v223_v52, %v223_v52 }
  0xb7   :  { %v237_v54 = vadd.f32 %v235_v53, %v233_v51  ;;  %v325_v51 = vld [vmem:[#allocation9] sm:$0xff] }
  0xb8   :  { %v326_v53 = vsub.f32 %v324_v50, %v325_v51 }
  0xb9   :  { %493 = vrsqrt.f32 %v237_v54  ;;  %v209_v55 = vpop.f32.mrf.mxu2  ;;  %vm246_vm1 = vcmp.eq.f32.partialorder %v237_v54, inf  ;;  %v249_v36 = vand.u32 2147483648, %v237_v54  ;;  %vm248_vm4 = vcmp.eq.f32.partialorder %v237_v54, 0.0 }
  0xba   :  { %v263_v56 = vmul.f32 %v209_v55, %v209_v55  ;;  %v228_v57 = vpop.f32.mrf.mxu3  ;;  %v629_v55 = vmov 585.0  }
  0xbb   :  { %v265_v58 = vmul.f32 %v228_v57, %v228_v57  ;;  %v206_v59 = vpop.f32.mrf.mxu0  ;;  %v630_v57 = vmov 1024.0  }
  0xbc   :  { %v234_v60 = vmul.f32 %v206_v59, %v206_v59  ;;  %v225_v61 = vpop.f32.mrf.mxu1 }
  0xbd   :  { %v267_v62 = vadd.f32 %v265_v58, %v263_v56  ;;  %v236_v63 = vmul.f32 %v225_v61, %v225_v61 }
  0xbf   :  { %v494_v0 = vpop.eup %493  ;;  %495 = vrsqrt.f32 %v267_v62  ;;  %v238_v1 = vadd.f32 %v236_v63, %v234_v60  ;;  %vm276_vm0 = vcmp.eq.f32.partialorder %v267_v62, inf  ;;  %v279_v33 = vand.u32 2147483648, %v267_v62 }
  0xc0   :  { %v240_v2 = vmul.f32 %v494_v0, %v237_v54  ;;  %vm278_vm2 = vcmp.eq.f32.partialorder %v267_v62, 0.0 }
  0xc1   :  { %497 = vrsqrt.f32 %v238_v1  ;;  %v211_v3 = vpop.f32.mrf.mxu2  ;;  %vm258_vm3 = vcmp.eq.f32.partialorder %v238_v1, inf  ;;  %v261_v41 = vand.u32 2147483648, %v238_v1  ;;  %vm260_vm6 = vcmp.eq.f32.partialorder %v238_v1, 0.0 }
  0xc2   :  { %v264_v4 = vmul.f32 %v211_v3, %v211_v3  ;;  %v230_v5 = vpop.f32.mrf.mxu3  ;;  %v241_v6 = vmul.f32 %v494_v0, %v240_v2 }
  0xc3   :  { %v266_v7 = vmul.f32 %v230_v5, %v230_v5 }
  0xc4   :  { %v242_v10 = vmul.f32 0.5, %v241_v6 }
  0xc5   :  { %v496_v8 = vpop.eup %495  ;;  %v268_v9 = vadd.f32 %v266_v7, %v264_v4 }
  0xc6   :  { %v270_v11 = vmul.f32 %v496_v8, %v267_v62  ;;  %v243_v15 = vsub.f32 1.5, %v242_v10 }
  0xc7   :  { %v498_v12 = vpop.eup %497  ;;  %499 = vrsqrt.f32 %v268_v9  ;;  %vm288_vm5 = vcmp.eq.f32.partialorder %v268_v9, inf  ;;  %v291_v42 = vand.u32 2147483648, %v268_v9  ;;  %vm290_vm7 = vcmp.eq.f32.partialorder %v268_v9, 0.0 }
  0xc8   :  { %v252_v13 = vmul.f32 %v498_v12, %v238_v1  ;;  %v271_v14 = vmul.f32 %v496_v8, %v270_v11  ;;  %v244_v21 = vmul.f32 %v494_v0, %v243_v15  ;;  %501 = vrcp.f32 %v629_v55 }
  0xc9   :  { %503 = vrcp.f32 %v630_v57 }
  0xca   :  { %v253_v16 = vmul.f32 %v498_v12, %v252_v13  ;;  %v272_v17 = vmul.f32 0.5, %v271_v14  ;;  %v245_v28 = vmul.f32 %v244_v21, %v237_v54 }
  0xcc   :  { %v254_v18 = vmul.f32 0.5, %v253_v16  ;;  %v273_v19 = vsub.f32 1.5, %v272_v17  ;;  %v247_v34 = vsel %vm246_vm1, %v237_v54, %v245_v28  ;;  %v327_v54 = vand.u32 2147483647, %v326_v53 }
  0xcd   :  { %v500_v20 = vpop.eup %499  ;;  %v250_v40 = vsel %vm248_vm4, %v249_v36, %v247_v34 }
  0xce   :  { %v255_v22 = vsub.f32 1.5, %v254_v18  ;;  %v274_v23 = vmul.f32 %v496_v8, %v273_v19  ;;  %v282_v24 = vmul.f32 %v500_v20, %v268_v9  ;;  %v502_v56 = vpop.eup %501 }
  0xcf   :  { %v316_v58 = vmul.f32 585.0, %v502_v56  ;;  %v504_v60 = vpop.eup %503  ;;  %vm320_vm8 = vweird.f32 %v502_v56 }
  0xd0   :  { %v256_v25 = vmul.f32 %v498_v12, %v255_v22  ;;  %v275_v26 = vmul.f32 %v274_v23, %v267_v62  ;;  %v283_v27 = vmul.f32 %v500_v20, %v282_v24  ;;  %vm343_vm9 = vweird.f32 %v504_v60 }
  0xd1   :  { %v317_v59 = vsub.f32 1.0, %v316_v58 }
  0xd2   :  { %v284_v29 = vmul.f32 0.5, %v283_v27  ;;  %v257_v30 = vmul.f32 %v256_v25, %v238_v1  ;;  %v277_v31 = vsel %vm276_vm0, %v267_v62, %v275_v26 }
  0xd3   :  { %v280_v37 = vsel %vm278_vm2, %v279_v33, %v277_v31  ;;  %v318_v0 = vmul.f32 %v502_v56, %v317_v59 }
  0xd4   :  { %v285_v32 = vsub.f32 1.5, %v284_v29  ;;  %v259_v38 = vsel %vm258_vm3, %v238_v1, %v257_v30  ;;  %v294_v44 = vsub.f32 %v250_v40, %v280_v37  ;;  %v339_v1 = vmul.f32 1024.0, %v504_v60 }
  0xd5   :  { %v262_v45 = vsel %vm260_vm6, %v261_v41, %v259_v38  ;;  %v319_v4 = vadd.f32 %v502_v56, %v318_v0 }
  0xd6   :  { %v286_v35 = vmul.f32 %v500_v20, %v285_v32  ;;  %v296_v48 = vand.u32 2147483647, %v294_v44  ;;  %v340_v5 = vsub.f32 1.0, %v339_v1 }
  0xd7   :  { %v321_v11 = vsel %vm320_vm8, %v502_v56, %v319_v4 }
  0xd8   :  { %v287_v39 = vmul.f32 %v286_v35, %v268_v9  ;;  %v341_v12 = vmul.f32 %v504_v60, %v340_v5 }
  0xda   :  { %v289_v43 = vsel %vm288_vm5, %v268_v9, %v287_v39  ;;  %v342_v15 = vadd.f32 %v504_v60, %v341_v12 }
  0xdb   :  { %v292_v46 = vsel %vm290_vm7, %v291_v42, %v289_v43 }
  0xdc   :  { %v295_v47 = vsub.f32 %v262_v45, %v292_v46  ;;  %v344_v18 = vsel %vm343_vm9, %v504_v60, %v342_v15 }
  0xde   :  { %v297_v49 = vand.u32 2147483647, %v295_v47 }
  0xe0   :  { %v298_v52 = vadd.f32 %v297_v49, %v296_v48 }
  0xe2   :  { %299 = vadd.xlane.f32.xlu0 %v298_v52 }
  0xea   :  { %328 = vadd.xlane.f32.xlu0 %v327_v54 }
 0x155   :  { %v300_v61 = vpop.xlane.xlu0 %299 }
 0x156   :  { %v301_v62 = vrot.slane %v300_v61, 4 }
 0x158   :  { %v302_v63 = vadd.f32 %v301_v62, %v300_v61 }
 0x15a   :  { %v303_v2 = vrot.slane %v302_v63, 2 }
 0x15c   :  { %v304_v3 = vadd.f32 %v303_v2, %v302_v63 }
 0x15d   :  { %v329_v6 = vpop.xlane.xlu0 %328 }
 0x15e   :  { %v330_v7 = vrot.slane %v329_v6, 4  ;;  %v305_v8 = vrot.slane %v304_v3, 1 }
 0x160   :  { %v331_v9 = vadd.f32 %v330_v7, %v329_v6  ;;  %v306_v10 = vadd.f32 %v305_v8, %v304_v3 }
 0x162   :  { %v332_v13 = vrot.slane %v331_v9, 2  ;;  %474 = vpush %v306_v10 }
 0x163   :  { %476 = vpush %v321_v11 }
 0x164   :  { %v333_v14 = vadd.f32 %v332_v13, %v331_v9 }
 0x166   :  { %v334_v16 = vrot.slane %v333_v14, 1 }
 0x168   :  { %v335_v17 = vadd.f32 %v334_v16, %v333_v14 }
 0x16a   :  { %478 = vpush %v335_v17 }
 0x16b   :  { %480 = vpush %v344_v18 }
 0x193   :  { %s475_s2 = spop %474 }
 0x194   :  { %s477_s3 = spop %476 }
 0x195   :  { %s323_s11 = smul.f32 %s477_s3, %s475_s2 }
 0x197   :  { %s337_s16 = smul.f32 11.0, %s323_s11 }
 0x19b   :  { %s479_s12 = spop %478 }
 0x19c   :  { %s481_s17 = spop %480 }
 0x19d   :  { %s346_s18 = smul.f32 %s481_s17, %s479_s12 }
 0x19f   :  { %s347_s19 = sadd.f32 %s346_s18, %s337_s16 }
 0x1a1   :  { %349 = sst [smem:[#allocation11]] %s347_s19 }
 0x1a2   :  { %358 = dma.smem_to_hbm %s631_s20, 16, %s356_s15, [#allocation5]  }
 0x1a3   :  { %619 = dma.done.wait [#allocation5], 16  }
 0x1a4   :  { %620 = vsyncadd [#allocation5], 4294967280 }
 0x1a5   :  { %363 = sfence }
 0x1a6   :  { %364 = vsyncpa [#allocation4], 1 }
 0x1a7   :  { %365 = vsyncpa [#allocation7], 1 }
 0x1a8   :  { %366 = vsyncpa [#allocation10], 1 }
 0x1a9   :  { %367 = vsyncpa [#allocation5], 1 }

</bundles_post_ra>
